<compile_context>
chip_gen: v7x
topology: tpu7x:2x2x1
jax: 0.10.0
libtpu: 0.0.40
codegen_flags: <defaults>
</compile_context>

<pallas_src>
import math
import functools

import jax
import jax.numpy as jnp
from jax.experimental import pallas as pl
from jax.experimental.pallas import tpu as pltpu


def build_pe_table(max_len: int, d_model: int, dtype=jnp.float32):
    """Replicates the torch buffer: pe[:, 0::2]=sin, pe[:, 1::2]=cos."""
    position = jnp.arange(max_len, dtype=jnp.float32)[:, None]              # (L, 1)
    div_term = jnp.exp(
        jnp.arange(0, d_model, 2, dtype=jnp.float32) * (-math.log(10000.0) / d_model)
    )                                                                        # (D/2,)
    ang = position * div_term                                                # (L, D/2)
    pe = jnp.zeros((max_len, d_model), dtype=jnp.float32)
    pe = pe.at[:, 0::2].set(jnp.sin(ang))
    pe = pe.at[:, 1::2].set(jnp.cos(ang))
    return pe.astype(dtype)                                                  # (L, D)


# ---------------- Pallas kernels ----------------

def _pe_add_kernel(x_ref, pe_ref, o_ref, *, batch):
    # x_ref: (ts, B*D) lane-dense; pe_ref: (ts, D) -> tiled across the batch.
    pe = jnp.tile(pe_ref[...], (1, batch))
    o_ref[...] = x_ref[...] + pe.astype(x_ref.dtype)


def _pe_add_dropout_kernel(x_ref, pe_ref, bits_ref, o_ref, *, batch, threshold, scale):
    # Inverted dropout: keep iff bits >= threshold (P(keep) = 1 - p).
    pe = jnp.tile(pe_ref[...], (1, batch))
    y = x_ref[...] + pe.astype(x_ref.dtype)
    keep = bits_ref[...] >= jnp.uint32(threshold)
    o_ref[...] = jnp.where(keep, y * jnp.asarray(scale, y.dtype),
                           jnp.zeros_like(y))


# ---------------- wrapper ----------------

_VMEM_BUDGET_BYTES = 24 << 20      # target resident (double-buffered) tile bytes
_VMEM_LIMIT_BYTES = 48 << 20       # scoped limit; safe on v5e/v6e/v7x
_MAX_SEQ_TILE = 4096


def _choose_seq_tile(S, row_bytes, budget_bytes=_VMEM_BUDGET_BYTES):
    tile = max(8, budget_bytes // max(int(row_bytes), 1))
    tile = (int(tile) // 8) * 8
    tile = max(8, min(tile, _MAX_SEQ_TILE))
    if tile >= S:
        return S                    # full-extent block: always layout-legal
    return tile                     # multiple of 8: satisfies (8,128) tiling


def positional_encoding(x, pe_table, *, dropout_p=0.1, training=False,
                        rng_key=None):
    """x: (S, B, D); pe_table: (max_len, D). Returns (S, B, D)."""
    S, B, D = x.shape
    assert pe_table.shape[0] >= S and pe_table.shape[1] == D

    BD = B * D
    x2 = x.reshape(S, BD)                             # lane-dense presentation
    itemsize = jnp.dtype(x.dtype).itemsize
    pe_itemsize = jnp.dtype(pe_table.dtype).itemsize

    use_dropout = training and dropout_p > 0.0
    if use_dropout and dropout_p >= 1.0:
        return jnp.zeros_like(x)                      # matches torch p=1 behavior

    # Per-seq-row double-buffered bytes: 2*(x + out) + 2*pe (+ 2*bits if training).
    row_bytes = 2 * (2 * BD * itemsize + D * pe_itemsize)
    if use_dropout:
        row_bytes += 2 * BD * 4
    seq_tile = _choose_seq_tile(S, row_bytes)
    grid = (pl.cdiv(S, seq_tile),)

    x_spec = pl.BlockSpec((seq_tile, BD), lambda i: (i, 0))
    pe_spec = pl.BlockSpec((seq_tile, D), lambda i: (i, 0))   # slices pe_table rows directly
    out_spec = pl.BlockSpec((seq_tile, BD), lambda i: (i, 0))
    out_shape = jax.ShapeDtypeStruct((S, BD), x.dtype)

    # TPU-specific compiler params only when actually running on TPU
    # (harmlessly skipped under CPU interpret harnesses).
    on_tpu = jax.devices()[0].platform == "tpu"
    compiler_params = (
        pltpu.CompilerParams(dimension_semantics=("parallel",),
                             vmem_limit_bytes=_VMEM_LIMIT_BYTES)
        if on_tpu else None
    )

    if not use_dropout:
        kernel = functools.partial(_pe_add_kernel, batch=B)
        y2 = pl.pallas_call(
            kernel,
            grid=grid,
            in_specs=[x_spec, pe_spec],
            out_specs=out_spec,
            out_shape=out_shape,
            compiler_params=compiler_params,
        )(x2, pe_table)
        return y2.reshape(S, B, D)

    if rng_key is None:
        rng_key = jax.random.PRNGKey(0)
    bits = jax.random.bits(rng_key, (S, BD), dtype=jnp.uint32)
    bits_spec = pl.BlockSpec((seq_tile, BD), lambda i: (i, 0))

    threshold = min(int(round(float(dropout_p) * (1 << 32))), (1 << 32) - 1)
    scale = 1.0 / (1.0 - float(dropout_p))
    kernel = functools.partial(_pe_add_dropout_kernel, batch=B,
                               threshold=threshold, scale=scale)
    y2 = pl.pallas_call(
        kernel,
        grid=grid,
        in_specs=[x_spec, pe_spec, bits_spec],
        out_specs=out_spec,
        out_shape=out_shape,
        compiler_params=compiler_params,
    )(x2, pe_table, bits)
    return y2.reshape(S, B, D)


if __name__ == "__main__":
    # Small shapes consistent with the module: seq=64, batch=2, d_model=128
    # (d_model chosen as a lane-width multiple so stores are unmasked).
    S, B, D = 64, 2, 128
    MAX_LEN = 5000  # matches the torch default
    P_DROP = 0.1

    key = jax.random.PRNGKey(0)
    kx, kd = jax.random.split(key)
    x = jax.random.normal(kx, (S, B, D), dtype=jnp.float32)
    pe_table = build_pe_table(MAX_LEN, D, dtype=jnp.float32)

    # Eval-mode forward (dropout = identity), checked against a pure-JAX reference.
    y = positional_encoding(x, pe_table, dropout_p=P_DROP, training=False)
    y = jax.block_until_ready(y)
    y_ref = x + pe_table[:S][:, None, :]
    assert y.shape == (S, B, D) and y.dtype == jnp.float32
    assert jnp.allclose(y, y_ref, atol=1e-6, rtol=1e-6), "eval mismatch vs reference"

    # Training-mode forward (inverted dropout fused with the PE add).
    y_tr = positional_encoding(x, pe_table, dropout_p=P_DROP, training=True,
                               rng_key=kd)
    y_tr = jax.block_until_ready(y_tr)
    assert y_tr.shape == (S, B, D)
    assert bool(jnp.all(jnp.isfinite(y_tr)))
    # Every element must be either dropped (0) or (x+pe)/(1-p).
    scaled = y_ref / (1.0 - P_DROP)
    ok = jnp.isclose(y_tr, 0.0, atol=1e-6) | jnp.isclose(y_tr, scaled,
                                                         atol=1e-5, rtol=1e-5)
    assert bool(jnp.all(ok)), "training-mode values are not {0, (x+pe)/(1-p)}"

    print("KERNEL_OK")
</pallas_src>

<mosaic_0001>
module attributes {stable_mosaic.version = 11 : i64} {
  func.func @_pe_add_kernel(%arg0: i32, %arg1: memref<64x256xf32, #tpu.memory_space<vmem>>, %arg2: memref<64x128xf32, #tpu.memory_space<vmem>>, %arg3: memref<64x256xf32, #tpu.memory_space<vmem>>) attributes {dimension_semantics = [#tpu.dimension_semantics<arbitrary>], iteration_bounds = array<i64: 1>, scalar_prefetch = 0 : i64, scratch_operands = 0 : i64, tpu.core_type = #tpu.core_type<tc>, window_params = [{transform_indices = @transform_0, window_bounds = array<i64: 64, 256>}, {transform_indices = @transform_1, window_bounds = array<i64: 64, 128>}, {transform_indices = @transform_2, window_bounds = array<i64: 64, 256>}]} {
    %c0 = arith.constant 0 : index
    %c0_0 = arith.constant 0 : index
    %0 = vector.load %arg2[%c0, %c0_0] : memref<64x128xf32, #tpu.memory_space<vmem>>, vector<64x128xf32>
    %1 = tpu.concatenate %0, %0 in 1 : vector<64x128xf32>, vector<64x128xf32> -> vector<64x256xf32>
    %c0_1 = arith.constant 0 : index
    %c0_2 = arith.constant 0 : index
    %2 = vector.load %arg1[%c0_1, %c0_2] : memref<64x256xf32, #tpu.memory_space<vmem>>, vector<64x256xf32>
    %3 = arith.addf %2, %1 : vector<64x256xf32>
    %c0_3 = arith.constant 0 : index
    %c0_4 = arith.constant 0 : index
    %4 = vector.load %arg3[%c0_3, %c0_4] : memref<64x256xf32, #tpu.memory_space<vmem>>, vector<64x256xf32>
    tpu.vector_store %arg3[%c0_3, %c0_4], %3 {strides = array<i32>} : memref<64x256xf32, #tpu.memory_space<vmem>>, vector<64x256xf32>,
    return
  }
  func.func @transform_0(%arg0: i32) -> (i32, i32) {
    %c0_i32 = arith.constant 0 : i32
    %c0_i32_0 = arith.constant 0 : i32
    return %arg0, %c0_i32 : i32, i32
  }
  func.func @transform_1(%arg0: i32) -> (i32, i32) {
    %c0_i32 = arith.constant 0 : i32
    %c0_i32_0 = arith.constant 0 : i32
    return %arg0, %c0_i32 : i32, i32
  }
  func.func @transform_2(%arg0: i32) -> (i32, i32) {
    %c0_i32 = arith.constant 0 : i32
    %c0_i32_0 = arith.constant 0 : i32
    return %arg0, %c0_i32 : i32, i32
  }
}

</mosaic_0001>

<bundles_post_ra>
// kernel: tpu_custom_call.1
= control target key start
LH: loop header
LB: loop body
LE: loop exit
PB: predicated region body
PF: predicated region fallthrough
CT: control target
= control target key end

     0   :  { %7 = vsyncpa [#allocation3], 0  ;;  %s260_s0 = inlined_call_operand.hbm [shape: f32[64,256], index: 0, kind: input, shape index: {}]   ;;  %s261_s1 = inlined_call_operand.hbm [shape: f32[5000,128], index: 1, kind: input, shape index: {}]   ;;  %s262_s2 = inlined_call_operand.hbm [shape: f32[64,256], index: 2, kind: output, shape index: {}]  }
   0x1   :  { %8 = vsyncpa [#allocation6], 0 }
   0x2   :  { %9 = vsyncpa [#allocation4], 0  ;;  %s193_s9 = smov [#allocation2]   ;;  %s121_s13 = scalar_lea.hbm %s260_s0, 2048 }
   0x3   :  { %s15_s10 = sshll.u32 %s193_s9, 4  ;;  %p122_p0 = scmp.ne.s32.totalorder %s260_s0, %s121_s13  ;;  %s16_s10 = int_to_ptr.vmem [resolvable:$true] %s15_s10 }
   0x4   :  { %p125_p1 = scmp.lt.u32.totalorder %s121_s13, %s260_s0 }
   0x6   :  { %p127_p2 = pnand %p125_p1, %p122_p0 }
   0x8   :  { %130 = shalt.err (!%p127_p2)
}
   0x9   :  { %s131_s18 = scalar_lea.vmem %s16_s10, 2048  ;;  %p136_p4 = scmp.lt.s32.totalorder %s16_s10, %s16_s10 }
   0xa   :  { %p132_p3 = scmp.ne.s32.totalorder %s16_s10, %s131_s18  ;;  %p137_p5 = scmp.lt.s32.totalorder %s131_s18, %s131_s18 }
   0xc   :  { %p138_p6 = por %p137_p5, %p136_p4 }
   0xe   :  { %p139_p7 = pnand %p138_p6, %p132_p3 }
  0x10   :  { %142 = shalt.err (!%p139_p7)
}
  0x11   :  { %s194_s19 = smov 256   ;;  %s195_s20 = smov 16  }
  0x12   :  { %21 = dma.hbm_to_vmem [thread:$0]  %s260_s0, 2048, %s16_s10, [#allocation3], %s194_s19, %s194_s19, %s195_s20  }
  0x13   :  { %s196_s23 = smov [#allocation5]   ;;  %s143_s27 = scalar_lea.hbm %s261_s1, 1024 }
  0x14   :  { %s27_s24 = sshll.u32 %s196_s23, 4  ;;  %p144_p8 = scmp.ne.s32.totalorder %s261_s1, %s143_s27  ;;  %s28_s24 = int_to_ptr.vmem [resolvable:$true] %s27_s24 }
  0x15   :  { %s145_s4 = scalar_lea.hbm %s261_s1, 80000  ;;  %p147_p10 = scmp.lt.u32.totalorder %s143_s27, %s261_s1 }
  0x16   :  { %p146_p9 = scmp.lt.u32.totalorder %s145_s4, %s143_s27 }
  0x18   :  { %p148_p11 = por %p147_p10, %p146_p9 }
  0x1a   :  { %p149_p12 = pnand %p148_p11, %p144_p8 }
  0x1c   :  { %152 = shalt.err (!%p149_p12)
}
  0x1d   :  { %s153_s0 = scalar_lea.vmem %s28_s24, 1024  ;;  %p158_p0 = scmp.lt.s32.totalorder %s28_s24, %s28_s24 }
  0x1e   :  { %p154_p13 = scmp.ne.s32.totalorder %s28_s24, %s153_s0  ;;  %p159_p1 = scmp.lt.s32.totalorder %s153_s0, %s153_s0 }
  0x20   :  { %p160_p2 = por %p159_p1, %p158_p0 }
  0x22   :  { %p161_p3 = pnand %p160_p2, %p154_p13 }
  0x24   :  { %164 = shalt.err (!%p161_p3)
}
  0x25   :  { %s197_s7 = smov 128   ;;  %s198_s8 = smov 8  }
  0x26   :  { %33 = dma.hbm_to_vmem [thread:$0]  %s261_s1, 1024, %s28_s24, [#allocation6], %s197_s7, %s197_s7, %s198_s8  }
  0x27   :  { %187 = dma.done.wait [#allocation3], 2048  }
  0x28   :  { %188 = vsyncadd [#allocation3], 4294965248 }
  0x29   :  { %189 = dma.done.wait [#allocation6], 1024  }
  0x2a   :  { %190 = vsyncadd [#allocation6], 4294966272  ;;  %v40_v0 = vld [vmem:[#allocation5] sm:$0xff]  ;;  %v49_v2 = vld [vmem:[#allocation2 + $0x8] sm:$0xff]  ;;  %s199_s1 = smov [#allocation7]  }
  0x2b   :  { %v48_v1 = vld [vmem:[#allocation2] sm:$0xff]  ;;  %v65_v4 = vadd.f32 %v49_v2, %v40_v0  ;;  %v41_v5 = vld [vmem:[#allocation5 + $0x8] sm:$0xff]  ;;  %v50_v6 = vld [vmem:[#allocation2 + $0x10] sm:$0xff]  ;;  %s101_s11 = sshll.u32 %s199_s1, 4  ;;  %s102_s11 = int_to_ptr.vmem [resolvable:$true] %s101_s11 }
  0x2c   :  { %v64_v3 = vadd.f32 %v48_v1, %v40_v0  ;;  %v51_v7 = vld [vmem:[#allocation2 + $0x18] sm:$0xff]  ;;  %v66_v8 = vadd.f32 %v50_v6, %v41_v5  ;;  %v42_v10 = vld [vmem:[#allocation5 + $0x10] sm:$0xff]  ;;  %v52_v11 = vld [vmem:[#allocation2 + $0x20] sm:$0xff]  ;;  %s165_s12 = scalar_lea.vmem %s102_s11, 2048  ;;  %p170_p5 = scmp.lt.s32.totalorder %s102_s11, %s102_s11 }
  0x2d   :  { %v67_v9 = vadd.f32 %v51_v7, %v41_v5  ;;  %v53_v12 = vld [vmem:[#allocation2 + $0x28] sm:$0xff]  ;;  %81 = vst [vmem:[#allocation7 + $0x8] sm:$0xff] %v65_v4  ;;  %v68_v13 = vadd.f32 %v52_v11, %v42_v10  ;;  %v43_v15 = vld [vmem:[#allocation5 + $0x18] sm:$0xff]  ;;  %v54_v16 = vld [vmem:[#allocation2 + $0x30] sm:$0xff]  ;;  %p166_p4 = scmp.ne.s32.totalorder %s102_s11, %s165_s12  ;;  %p171_p6 = scmp.lt.s32.totalorder %s165_s12, %s165_s12 }
  0x2e   :  { %80 = vst [vmem:[#allocation7] sm:$0xff] %v64_v3  ;;  %v69_v14 = vadd.f32 %v53_v12, %v42_v10  ;;  %v55_v17 = vld [vmem:[#allocation2 + $0x38] sm:$0xff]  ;;  %82 = vst [vmem:[#allocation7 + $0x10] sm:$0xff] %v66_v8  ;;  %v70_v18 = vadd.f32 %v54_v16, %v43_v15  ;;  %v44_v20 = vld [vmem:[#allocation5 + $0x20] sm:$0xff] }
  0x2f   :  { %83 = vst [vmem:[#allocation7 + $0x18] sm:$0xff] %v67_v9  ;;  %v71_v19 = vadd.f32 %v55_v17, %v43_v15  ;;  %v56_v21 = vld [vmem:[#allocation2 + $0x40] sm:$0xff]  ;;  %v57_v22 = vld [vmem:[#allocation2 + $0x48] sm:$0xff]  ;;  %84 = vst [vmem:[#allocation7 + $0x20] sm:$0xff] %v68_v13  ;;  %p172_p7 = por %p171_p6, %p170_p5 }
  0x30   :  { %85 = vst [vmem:[#allocation7 + $0x28] sm:$0xff] %v69_v14  ;;  %v72_v23 = vadd.f32 %v56_v21, %v44_v20  ;;  %v73_v24 = vadd.f32 %v57_v22, %v44_v20  ;;  %v45_v25 = vld [vmem:[#allocation5 + $0x28] sm:$0xff]  ;;  %v58_v26 = vld [vmem:[#allocation2 + $0x50] sm:$0xff]  ;;  %v59_v27 = vld [vmem:[#allocation2 + $0x58] sm:$0xff] }
  0x31   :  { %86 = vst [vmem:[#allocation7 + $0x30] sm:$0xff] %v70_v18  ;;  %87 = vst [vmem:[#allocation7 + $0x38] sm:$0xff] %v71_v19  ;;  %v74_v28 = vadd.f32 %v58_v26, %v45_v25  ;;  %v75_v29 = vadd.f32 %v59_v27, %v45_v25  ;;  %v46_v30 = vld [vmem:[#allocation5 + $0x30] sm:$0xff]  ;;  %v60_v31 = vld [vmem:[#allocation2 + $0x60] sm:$0xff]  ;;  %p173_p8 = pnand %p172_p7, %p166_p4 }
  0x32   :  { %v61_v32 = vld [vmem:[#allocation2 + $0x68] sm:$0xff]  ;;  %88 = vst [vmem:[#allocation7 + $0x40] sm:$0xff] %v72_v23  ;;  %89 = vst [vmem:[#allocation7 + $0x48] sm:$0xff] %v73_v24  ;;  %v76_v33 = vadd.f32 %v60_v31, %v46_v30  ;;  %v47_v35 = vld [vmem:[#allocation5 + $0x38] sm:$0xff] }
  0x33   :  { %v77_v34 = vadd.f32 %v61_v32, %v46_v30  ;;  %v62_v36 = vld [vmem:[#allocation2 + $0x70] sm:$0xff]  ;;  %v63_v37 = vld [vmem:[#allocation2 + $0x78] sm:$0xff]  ;;  %90 = vst [vmem:[#allocation7 + $0x50] sm:$0xff] %v74_v28  ;;  %91 = vst [vmem:[#allocation7 + $0x58] sm:$0xff] %v75_v29 }
  0x34   :  { %v78_v38 = vadd.f32 %v62_v36, %v47_v35  ;;  %v79_v39 = vadd.f32 %v63_v37, %v47_v35  ;;  %92 = vst [vmem:[#allocation7 + $0x60] sm:$0xff] %v76_v33 }
  0x35   :  { %93 = vst [vmem:[#allocation7 + $0x68] sm:$0xff] %v77_v34 }
  0x36   :  { %94 = vst [vmem:[#allocation7 + $0x70] sm:$0xff] %v78_v38  ;;  %95 = vst [vmem:[#allocation7 + $0x78] sm:$0xff] %v79_v39 }
  0x37   :  { %176 = shalt.err (!%p173_p8)
}
  0x38   :  { %s177_s15 = scalar_lea.hbm %s262_s2, 2048 }
  0x39   :  { %p178_p9 = scmp.ne.s32.totalorder %s262_s2, %s177_s15  ;;  %p181_p10 = scmp.lt.u32.totalorder %s177_s15, %s262_s2 }
  0x3b   :  { %p183_p11 = pnand %p181_p10, %p178_p9 }
  0x3d   :  { %186 = shalt.err (!%p183_p11)
}
  0x3e   :  { %107 = dma.vmem_to_hbm [thread:$0]  %s102_s11, 2048, %s262_s2, [#allocation4], %s194_s19, %s194_s19, %s195_s20  }
  0x3f   :  { %191 = dma.done.wait [#allocation4], 2048  }
  0x40   :  { %192 = vsyncadd [#allocation4], 4294965248 }
  0x41   :  { %111 = vsyncpa [#allocation3], 1 }
  0x42   :  { %112 = vsyncpa [#allocation6], 1 }
  0x43   :  { %113 = vsyncpa [#allocation4], 1 }

</bundles_post_ra>
